<compile_context>
chip_gen: v5e
topology: v5e:2x2
jax: 0.10.0
libtpu: 0.0.40
codegen_flags: <defaults>
</compile_context>

<pallas_src>
import math

import jax
import jax.numpy as jnp
from jax.experimental import pallas as pl
from jax.experimental.pallas import tpu as pltpu

WIDTH = 1024                 # lanes per row of the 2-D slab (multiple of 128)
MIN_PALLAS_ELEMS = 1 << 18   # below this a single fused XLA op is strictly cheaper


def _poly3_kernel(coef_ref, x_ref, o_ref):
    # coef_ref: SMEM (4,) f32 -> a, b, c, d
    # x_ref / o_ref: VMEM (block_rows, WIDTH) tiles
    a = coef_ref[0]
    b = coef_ref[1]
    c = coef_ref[2]
    d = coef_ref[3]
    x = x_ref[...].astype(jnp.float32)
    # Horner's rule: a + x*(b + x*(c + x*d)) -- 6 VALU ops/elem, hidden under DMA.
    o_ref[...] = (a + x * (b + x * (c + x * d))).astype(o_ref.dtype)


def _tpu_generation():
    try:
        kind = jax.devices()[0].device_kind.lower()
    except Exception:
        return "unknown"
    if "v7" in kind:
        return "v7x"
    if "v6" in kind:
        return "v6e"
    if "v5" in kind:
        return "v5e"
    return "unknown"


def _block_config():
    """Returns (max_block_rows, vmem_limit_bytes_or_None, want_two_grid_steps)."""
    gen = _tpu_generation()
    if gen == "v6e":
        # 8 MiB blocks; double-buffered in+out = 32 MiB -> lift the scoped VMEM limit.
        return 2048, 64 << 20, False
    if gen == "v7x":
        # 64 MiB physical VMEM: cap at 4 MiB blocks; force >= 2 grid steps so the
        # "parallel" axis actually shards across both TensorCores.
        # TODO(synk): if xprof shows exposed input DMA at large N on v7x, sweep
        # pipeline_mode=pl.Buffered(3) on the x BlockSpec.
        return 1024, None, True
    # v5e / unknown: 2 MiB blocks fit the 16 MiB default scoped VMEM.
    return 512, None, False


def _choose_block_rows(rows_needed, max_block_rows, want_two_steps):
    if rows_needed <= max_block_rows and not (want_two_steps and rows_needed >= 16):
        return rows_needed  # single full-extent block (always layout-legal)
    target = max_block_rows
    if want_two_steps:
        target = min(target, pl.cdiv(rows_needed, 2))
    target = max(8, (target // 8) * 8)  # keep the sublane block dim a multiple of 8
    return min(target, rows_needed)


def polynomial3_forward(x, a, b, c, d, *, min_pallas_elems=MIN_PALLAS_ELEMS):
    """Forward pass of Polynomial3: a + b*x + c*x^2 + d*x^3 (elementwise)."""
    orig_shape = x.shape
    dtype = x.dtype
    n = x.size

    if n < max(min_pallas_elems, 1):
        # Tiny input: one fused XLA elementwise op beats custom-call dispatch +
        # per-step pipeline overhead and avoids any pad/reshape/slice HBM traffic.
        xf = x.astype(jnp.float32)
        y = a + xf * (b + xf * (c + xf * d))
        return y.astype(dtype)

    max_block_rows, vmem_limit, want_two_steps = _block_config()
    rows_needed = pl.cdiv(n, WIDTH)
    block_rows = _choose_block_rows(rows_needed, max_block_rows, want_two_steps)

    x_flat = x.reshape(-1)            # free: contiguous flatten
    rem = n % WIDTH
    if rem != 0:
        # Only the non-lane-aligned case pays a pad (and trailing slice) pass.
        # TODO(synk): for peak throughput on oddly-sized large inputs, accept an
        # already lane-aligned 2-D buffer from the caller to skip this entirely.
        x_flat = jnp.pad(x_flat, (0, WIDTH - rem))
    x2d = x_flat.reshape(rows_needed, WIDTH)

    # Coefficients as a (4,) f32 SMEM vector; constant index_map => copied once.
    coefs = jnp.stack(
        [jnp.asarray(v).astype(jnp.float32).reshape(()) for v in (a, b, c, d)]
    )

    grid = (pl.cdiv(rows_needed, block_rows),)
    cp_kwargs = dict(dimension_semantics=("parallel",))
    if vmem_limit is not None:
        cp_kwargs["vmem_limit_bytes"] = vmem_limit

    out2d = pl.pallas_call(
        _poly3_kernel,
        out_shape=jax.ShapeDtypeStruct((rows_needed, WIDTH), dtype),
        grid=grid,
        in_specs=[
            pl.BlockSpec((4,), lambda i: (0,), memory_space=pltpu.SMEM),  # coeffs
            pl.BlockSpec((block_rows, WIDTH), lambda i: (i, 0)),          # x tile
        ],
        out_specs=pl.BlockSpec((block_rows, WIDTH), lambda i: (i, 0)),
        compiler_params=pltpu.CompilerParams(**cp_kwargs),
    )(coefs, x2d)

    out_flat = out2d.reshape(-1)
    if rem != 0:
        out_flat = out_flat[:n]
    return out_flat.reshape(orig_shape)


if __name__ == "__main__":
    # Deterministic parameters (torch.randn(()) equivalents).
    key = jax.random.PRNGKey(0)
    ka, kb, kc, kd = jax.random.split(key, 4)
    a = jax.random.normal(ka, (), dtype=jnp.float32)
    b = jax.random.normal(kb, (), dtype=jnp.float32)
    c = jax.random.normal(kc, (), dtype=jnp.float32)
    d = jax.random.normal(kd, (), dtype=jnp.float32)

    # Module's input: x = linspace(-pi, pi, 2000). Force the Pallas path so the
    # kernel itself is exercised (the default heuristic would route something
    # this small to the fused jnp fast path).
    x = jnp.linspace(-math.pi, math.pi, 2000, dtype=jnp.float32)
    y_ref = a + b * x + c * x ** 2 + d * x ** 3

    y_pallas = jax.block_until_ready(
        polynomial3_forward(x, a, b, c, d, min_pallas_elems=0))
    assert y_pallas.shape == x.shape
    assert jnp.allclose(y_pallas, y_ref, atol=1e-5, rtol=1e-5)

    # Default heuristic path (tiny input -> single fused jnp op, no Pallas launch).
    y_fast = jax.block_until_ready(polynomial3_forward(x, a, b, c, d))
    assert jnp.allclose(y_fast, y_ref, atol=1e-5, rtol=1e-5)

    # Lane-aligned small multi-dim shape (2*4*16*16 = 2048 = 2*1024): exercises
    # the zero-copy (no pad / no slice) Pallas path.
    x2 = jax.random.normal(jax.random.PRNGKey(1), (2, 4, 16, 16), dtype=jnp.float32)
    y2_ref = a + b * x2 + c * x2 ** 2 + d * x2 ** 3
    y2 = jax.block_until_ready(
        polynomial3_forward(x2, a, b, c, d, min_pallas_elems=0))
    assert y2.shape == x2.shape
    assert jnp.allclose(y2, y2_ref, atol=1e-5, rtol=1e-5)

    print("KERNEL_OK")
</pallas_src>

<mosaic_0001>
module attributes {stable_mosaic.version = 11 : i64} {
  func.func @_poly3_kernel(%arg0: i32, %arg1: memref<4xf32, #tpu.memory_space<smem>>, %arg2: memref<2x1024xf32, #tpu.memory_space<vmem>>, %arg3: memref<2x1024xf32, #tpu.memory_space<vmem>>) attributes {dimension_semantics = [#tpu.dimension_semantics<parallel>], iteration_bounds = array<i64: 1>, scalar_prefetch = 0 : i64, scratch_operands = 0 : i64, tpu.core_type = #tpu.core_type<tc>, window_params = [{transform_indices = @transform_0, window_bounds = array<i64: 4>}, {transform_indices = @transform_1, window_bounds = array<i64: 2, 1024>}, {transform_indices = @transform_2, window_bounds = array<i64: 2, 1024>}]} {
    %c0 = arith.constant 0 : index
    %0 = memref.load %arg1[%c0] : memref<4xf32, #tpu.memory_space<smem>>
    %c1 = arith.constant 1 : index
    %1 = memref.load %arg1[%c1] : memref<4xf32, #tpu.memory_space<smem>>
    %c2 = arith.constant 2 : index
    %2 = memref.load %arg1[%c2] : memref<4xf32, #tpu.memory_space<smem>>
    %c3 = arith.constant 3 : index
    %3 = memref.load %arg1[%c3] : memref<4xf32, #tpu.memory_space<smem>>
    %c0_0 = arith.constant 0 : index
    %c0_1 = arith.constant 0 : index
    %4 = vector.load %arg2[%c0_0, %c0_1] : memref<2x1024xf32, #tpu.memory_space<vmem>>, vector<2x1024xf32>
    %5 = vector.broadcast %3 : f32 to vector<2x1024xf32>
    %6 = arith.mulf %4, %5 : vector<2x1024xf32>
    %7 = vector.broadcast %2 : f32 to vector<2x1024xf32>
    %8 = arith.addf %7, %6 : vector<2x1024xf32>
    %9 = arith.mulf %4, %8 : vector<2x1024xf32>
    %10 = vector.broadcast %1 : f32 to vector<2x1024xf32>
    %11 = arith.addf %10, %9 : vector<2x1024xf32>
    %12 = arith.mulf %4, %11 : vector<2x1024xf32>
    %13 = vector.broadcast %0 : f32 to vector<2x1024xf32>
    %14 = arith.addf %13, %12 : vector<2x1024xf32>
    %c0_2 = arith.constant 0 : index
    %c0_3 = arith.constant 0 : index
    %15 = vector.load %arg3[%c0_2, %c0_3] : memref<2x1024xf32, #tpu.memory_space<vmem>>, vector<2x1024xf32>
    tpu.vector_store %arg3[%c0_2, %c0_3], %14 {strides = array<i32>} : memref<2x1024xf32, #tpu.memory_space<vmem>>, vector<2x1024xf32>,
    return
  }
  func.func @transform_0(%arg0: i32) -> i32 {
    %c0_i32 = arith.constant 0 : i32
    %c0_i32_0 = arith.constant 0 : i32
    return %c0_i32 : i32
  }
  func.func @transform_1(%arg0: i32) -> (i32, i32) {
    %c0_i32 = arith.constant 0 : i32
    %c0_i32_0 = arith.constant 0 : i32
    return %arg0, %c0_i32 : i32, i32
  }
  func.func @transform_2(%arg0: i32) -> (i32, i32) {
    %c0_i32 = arith.constant 0 : i32
    %c0_i32_0 = arith.constant 0 : i32
    return %arg0, %c0_i32 : i32, i32
  }
}

</mosaic_0001>

<bundles_post_ra>
// kernel: tpu_custom_call.1
= control target key start
LH: loop header
LB: loop body
LE: loop exit
PB: predicated region body
PF: predicated region fallthrough
CT: control target
= control target key end

     0   :  { %7 = vsyncpa [#allocation5], 0  ;;  %s180_s0 = inlined_call_operand.hbm [shape: f32[4], index: 0, kind: input, shape index: {}]   ;;  %s181_s1 = inlined_call_operand.hbm [shape: f32[2,1024], index: 1, kind: input, shape index: {}]   ;;  %s182_s2 = inlined_call_operand.hbm [shape: f32[2,1024], index: 2, kind: output, shape index: {}]  }
   0x1   :  { %8 = vsyncpa [#allocation3], 0 }
   0x2   :  { %9 = vsyncpa [#allocation4], 0  ;;  %s15_s11 = sshll.u32 %s180_s0, 4  ;;  %s24_s14 = sshll.u32 %s181_s1, 4  ;;  %s16_s11 = int_to_ptr.hbm [resolvable:$true] %s15_s11  ;;  %s25_s14 = int_to_ptr.hbm [resolvable:$true] %s24_s14 }
   0x3   :  { %s153_s15 = smov [#allocation2]   ;;  %s154_s16 = smov [#allocation6]  }
   0x4   :  { %18 = dma.hbm_to_smem %s16_s11, 16, %s153_s15, [#allocation5]  }
   0x5   :  { %s26_s17 = sshll.u32 %s154_s16, 4  ;;  %s27_s17 = int_to_ptr.vmem [resolvable:$true] %s26_s17 }
   0x6   :  { %29 = dma.hbm_to_vmem [thread:$0]  %s25_s14, 256, %s27_s17, [#allocation3]  }
   0x7   :  { %147 = dma.done.wait [#allocation5], 16  }
   0x8   :  { %148 = vsyncadd [#allocation5], 4294967280 }
   0x9   :  { %149 = dma.done.wait [#allocation3], 256  }
   0xa   :  { %150 = vsyncadd [#allocation3], 4294967040 }
   0xb   :  { %38 = sfence }
   0xc   :  { %s82_s18 = sld [smem:[#allocation2 + $0x2]]  ;;  %v43_v0 = vld [vmem:[#allocation6] sm:$0xff]  ;;  %v44_v1 = vld [vmem:[#allocation6 + $0x8] sm:$0xff]  ;;  %s155_s1 = smov [#allocation7]  }
   0xd   :  { %s83_s19 = sld [smem:[#allocation2 + $0x3]]  ;;  %s68_s21 = sshll.u32 %s155_s1, 4  ;;  %s69_s21 = int_to_ptr.vmem [resolvable:$true] %s68_s21 }
   0xe   :  { %s81_s0 = sld [smem:[#allocation2 + $0x1]]  ;;  %s70_s24 = sshll.u32 %s182_s2, 4  ;;  %s71_s24 = int_to_ptr.hbm [resolvable:$true] %s70_s24 }
   0xf   :  { %s39_s20 = sld [smem:[#allocation2]] }
  0x12   :  { %v48_v3 = vstv %s82_s18 }
  0x13   :  { %v45_v2 = vstv %s83_s19 }
  0x14   :  { %v46_v4 = vmul.f32 %v45_v2, %v43_v0  ;;  %v47_v5 = vmul.f32 %v45_v2, %v44_v1  ;;  %v53_v8 = vstv %s81_s0 }
  0x15   :  { %v58_v13 = vstv %s39_s20 }
  0x16   :  { %v49_v6 = vadd.f32 %v48_v3, %v46_v4  ;;  %v50_v7 = vadd.f32 %v48_v3, %v47_v5 }
  0x18   :  { %v51_v9 = vmul.f32 %v49_v6, %v43_v0  ;;  %v52_v10 = vmul.f32 %v50_v7, %v44_v1 }
  0x1a   :  { %v54_v11 = vadd.f32 %v53_v8, %v51_v9  ;;  %v55_v12 = vadd.f32 %v53_v8, %v52_v10 }
  0x1c   :  { %v56_v14 = vmul.f32 %v54_v11, %v43_v0  ;;  %v57_v15 = vmul.f32 %v55_v12, %v44_v1 }
  0x1e   :  { %v59_v16 = vadd.f32 %v58_v13, %v56_v14  ;;  %v60_v17 = vadd.f32 %v58_v13, %v57_v15 }
  0x20   :  { %61 = vst [vmem:[#allocation7] sm:$0xff] %v59_v16 }
  0x21   :  { %62 = vst [vmem:[#allocation7 + $0x8] sm:$0xff] %v60_v17 }
  0x22   :  { %73 = dma.vmem_to_hbm [thread:$0]  %s69_s21, 256, %s71_s24, [#allocation4]  }
  0x23   :  { %151 = dma.done.wait [#allocation4], 256  }
  0x24   :  { %152 = vsyncadd [#allocation4], 4294967040 }
  0x25   :  { %78 = vsyncpa [#allocation3], 1 }
  0x26   :  { %79 = vsyncpa [#allocation4], 1 }
  0x27   :  { %80 = vsyncpa [#allocation5], 1 }

</bundles_post_ra>
